<compile_context>
chip_gen: v7x
topology: tpu7x:2x2x1
jax: 0.10.0
libtpu: 0.0.40
codegen_flags: <defaults>
</compile_context>

<pallas_src>
import functools

import jax
import jax.numpy as jnp
from jax.experimental import pallas as pl
from jax.experimental.pallas import tpu as pltpu


# ----------------------------------------------------------------------------
# Single fused Pallas kernel (gridded over batch)
# ----------------------------------------------------------------------------

def _fused_forward_kernel(ab_ref, u_ref,                       # SMEM scalars (B,)
                          cpad_ref, emb_ref, x0_ref, noise_ref, jn_ref,
                          conv_w_ref, conv_b_ref,
                          ff1_w_ref, ff1_b_ref, ff2_w_ref, ff2_b_ref,
                          out_w_ref, out_b_ref,
                          jw1_ref, jb1_ref, jw2_ref, jb2_ref,
                          temb_w_ref, temb_b_ref,
                          w1x_ref, w1t_ref, w1h_ref, b1_ref,
                          w2_ref, b2_ref, whead_ref, bhead_ref,
                          out_ref, *, lc, inv_lc):
    bf16 = jnp.bfloat16
    f32 = jnp.float32
    b = pl.program_id(0)

    # ---- multi-scale conv (k=1/3/5 pre-fused into one (5*Cin, H) weight):
    # form the 5 taps from the zero-padded condition block in-kernel.
    taps = [cpad_ref[0, k:k + lc, :] for k in range(5)]          # 5 x (Lc, Cin)
    cols = jnp.concatenate(taps, axis=1)                         # (Lc, 5*Cin)
    # TODO(synk): reference MultiScaleConditionEncoder internals unavailable;
    # branch outputs are summed pre-activation (single fused matmul + ReLU) and
    # the transformer layers (nhead=4, dropout=0.1) are approximated by two
    # position-wise FFN layers (dropout omitted).
    feat = jnp.dot(cols.astype(bf16), conv_w_ref[...],
                   preferred_element_type=f32) + conv_b_ref[...]
    feat = jnp.maximum(feat, 0.0)
    feat = jnp.dot(feat.astype(bf16), ff1_w_ref[...],
                   preferred_element_type=f32) + ff1_b_ref[...]
    feat = jnp.maximum(feat, 0.0)
    feat = jnp.dot(feat.astype(bf16), ff2_w_ref[...],
                   preferred_element_type=f32) + ff2_b_ref[...]
    feat = jnp.maximum(feat, 0.0)                                # (Lc, H)

    # ---- mean pool over the condition sequence (XLU reduce, exact f32 1/Lc)
    pooled = jnp.sum(feat, axis=0, keepdims=True) * inv_lc       # (1, H)
    h = jnp.dot(pooled.astype(bf16), out_w_ref[...],
                preferred_element_type=f32) + out_b_ref[...]     # (1, cond)

    # ---- adaptive jump MLP + sigmoid / softplus / bernoulli mask (in-kernel)
    z = jnp.dot(h.astype(bf16), jw1_ref[...],
                preferred_element_type=f32) + jb1_ref[...]
    z = jnp.maximum(z, 0.0)
    jraw = jnp.dot(z.astype(bf16), jw2_ref[...],
                   preferred_element_type=f32) + jb2_ref[...]    # (1, 2)
    jump_prob = 1.0 / (1.0 + jnp.exp(-jraw[:, 0:1]))             # sigmoid (1,1)
    jump_scale = jnp.log(1.0 + jnp.exp(jraw[:, 1:2]))            # softplus (1,1)
    u = u_ref[b]                                                 # SMEM scalar
    msc = jnp.where(u < jump_prob, jump_scale, 0.0)              # (1, 1)

    # ---- q_sample: sqrt(ab)*x0 + sqrt(1-ab)*noise + mask*scale*jump_noise
    ab = jnp.full((1, 1), ab_ref[b], dtype=f32)                  # SMEM scalar
    s1 = jnp.sqrt(ab)
    s2 = jnp.sqrt(jnp.maximum(1.0 - ab, 0.0))
    x_t = s1 * x0_ref[0] + s2 * noise_ref[0] + msc * jn_ref[0]   # (S, F)

    # ---- time-embedding MLP: silu(emb @ W + b)
    te = jnp.dot(emb_ref[0].astype(bf16), temb_w_ref[...],
                 preferred_element_type=f32) + temb_b_ref[...]   # (1, Td)
    te = te * (1.0 / (1.0 + jnp.exp(-te)))

    # ---- denoiser layer 1: per-batch (1, H) term sublane-broadcast over S
    zb = (jnp.dot(te.astype(bf16), w1t_ref[...], preferred_element_type=f32)
          + jnp.dot(h.astype(bf16), w1h_ref[...], preferred_element_type=f32)
          + b1_ref[...])                                         # (1, H)
    h1 = jnp.dot(x_t.astype(bf16), w1x_ref[...],
                 preferred_element_type=f32) + zb                # (S, H)
    h1 = jnp.maximum(h1, 0.0)

    # ---- denoiser layer 2
    h2 = jnp.dot(h1.astype(bf16), w2_ref[...],
                 preferred_element_type=f32) + b2_ref[...]
    h2 = jnp.maximum(h2, 0.0)

    # ---- merged heads (x0_pred | log_sigma): one matmul, one store
    out = jnp.dot(h2.astype(bf16), whead_ref[...],
                  preferred_element_type=f32) + bhead_ref[...]   # (S, 2F)
    out_ref[0] = out.astype(out_ref.dtype)


# ----------------------------------------------------------------------------
# Wrapper: one pallas_call, grid over batch, weights resident across steps
# ----------------------------------------------------------------------------

def _full_spec(a):
    nd = a.ndim
    return pl.BlockSpec(a.shape, lambda b, _nd=nd: (0,) * _nd)


def model_forward(prep, alpha_bars, x0, c, t, key):
    B, S, F = x0.shape
    Lc, Cin = c.shape[1], c.shape[2]
    Td = prep["temb_w"].shape[0]
    F2 = prep["whead"].shape[1]

    # --- diffusion randoms (JAX PRNG) --------------------------------------
    # TODO(synk): Diffusion.q_sample jump semantics assumed: one bernoulli draw
    # per batch element, additive gaussian jump noise scaled by jump_scale.
    k_noise, k_jump_u, k_jump_n = jax.random.split(key, 3)
    noise = jax.random.normal(k_noise, (B, S, F), dtype=jnp.float32)
    jnoise = jax.random.normal(k_jump_n, (B, S, F), dtype=jnp.float32)
    u = jax.random.uniform(k_jump_u, (B,), dtype=jnp.float32)

    ab = alpha_bars[t].astype(jnp.float32)                        # (B,)

    # sinusoidal basis (tiny B x Td op; sin/cos kept outside the kernel)
    # TODO(synk): move into the kernel once sin/cos lowering is guaranteed.
    half = Td // 2
    freqs = jnp.exp(-jnp.log(10000.0)
                    * jnp.arange(half, dtype=jnp.float32) / half)
    args = t.astype(jnp.float32)[:, None] * freqs[None, :]
    emb = jnp.concatenate([jnp.sin(args), jnp.cos(args)],
                          axis=-1).reshape(B, 1, Td)

    # padded condition (no im2col duplication; taps formed in-kernel)
    cpad = jnp.pad(c, ((0, 0), (2, 2), (0, 0)))                   # (B, Lc+4, Cin)

    kernel = functools.partial(_fused_forward_kernel, lc=Lc, inv_lc=1.0 / Lc)
    smem = pl.BlockSpec(memory_space=pltpu.MemorySpace.SMEM)

    out = pl.pallas_call(
        kernel,
        grid=(B,),
        in_specs=[
            smem, smem,                                           # ab, u
            pl.BlockSpec((1, Lc + 4, Cin), lambda b: (b, 0, 0)),  # cpad
            pl.BlockSpec((1, 1, Td), lambda b: (b, 0, 0)),        # emb
            pl.BlockSpec((1, S, F), lambda b: (b, 0, 0)),         # x0
            pl.BlockSpec((1, S, F), lambda b: (b, 0, 0)),         # noise
            pl.BlockSpec((1, S, F), lambda b: (b, 0, 0)),         # jump noise
            _full_spec(prep["conv_w"]), _full_spec(prep["conv_b"]),
            _full_spec(prep["ff1_w"]), _full_spec(prep["ff1_b"]),
            _full_spec(prep["ff2_w"]), _full_spec(prep["ff2_b"]),
            _full_spec(prep["enc_out_w"]), _full_spec(prep["enc_out_b"]),
            _full_spec(prep["jump_w1"]), _full_spec(prep["jump_b1"]),
            _full_spec(prep["jump_w2"]), _full_spec(prep["jump_b2"]),
            _full_spec(prep["temb_w"]), _full_spec(prep["temb_b"]),
            _full_spec(prep["w1x"]), _full_spec(prep["w1t"]),
            _full_spec(prep["w1h"]), _full_spec(prep["b1"]),
            _full_spec(prep["w2"]), _full_spec(prep["b2"]),
            _full_spec(prep["whead"]), _full_spec(prep["bhead"]),
        ],
        out_specs=pl.BlockSpec((1, S, F2), lambda b: (b, 0, 0)),
        out_shape=jax.ShapeDtypeStruct((B, S, F2), jnp.float32),
        compiler_params=pltpu.CompilerParams(
            dimension_semantics=("parallel",),
            vmem_limit_bytes=48 * 1024 * 1024),
    )(ab, u, cpad, emb, x0, noise, jnoise,
      prep["conv_w"], prep["conv_b"],
      prep["ff1_w"], prep["ff1_b"], prep["ff2_w"], prep["ff2_b"],
      prep["enc_out_w"], prep["enc_out_b"],
      prep["jump_w1"], prep["jump_b1"], prep["jump_w2"], prep["jump_b2"],
      prep["temb_w"], prep["temb_b"],
      prep["w1x"], prep["w1t"], prep["w1h"], prep["b1"],
      prep["w2"], prep["b2"], prep["whead"], prep["bhead"])

    x0_pred = out[..., :F]
    log_sigma = out[..., F:]
    return x0_pred, log_sigma


# ----------------------------------------------------------------------------
# Parameter init (deterministic, synthetic) and one-time prep (fusion, bf16)
# ----------------------------------------------------------------------------

def _init_linear(key, fan_in, fan_out):
    w = 0.02 * jax.random.normal(key, (fan_in, fan_out), dtype=jnp.float32)
    b = jnp.zeros((fan_out,), dtype=jnp.float32)
    return w, b


def init_params(key, *, feature_dim, cond_input_dim, cond_dim,
                time_embed_dim, hidden_dim):
    ks = jax.random.split(key, 16)
    p = {}
    # MultiScaleConditionEncoder: conv1d branches k=1,3,5
    for i, k in enumerate((1, 3, 5)):
        p[f"conv{k}_w"], p[f"conv{k}_b"] = _init_linear(
            ks[i], k * cond_input_dim, hidden_dim)
    # TODO(synk): transformer encoder layers (nhead=4, dropout=0.1) approximated
    # by position-wise feed-forward layers; reference internals unavailable.
    p["enc_ff1_w"], p["enc_ff1_b"] = _init_linear(ks[3], hidden_dim, hidden_dim)
    p["enc_ff2_w"], p["enc_ff2_b"] = _init_linear(ks[4], hidden_dim, hidden_dim)
    p["enc_out_w"], p["enc_out_b"] = _init_linear(ks[5], hidden_dim, cond_dim)
    # TimeEmbedding: sinusoid -> Linear(silu)
    p["temb_w"], p["temb_b"] = _init_linear(ks[6], time_embed_dim, time_embed_dim)
    # AdaptiveJumpModule: cond_dim -> hidden_dim//2 -> 2 (prob, scale)
    p["jump_w1"], p["jump_b1"] = _init_linear(ks[7], cond_dim, hidden_dim // 2)
    p["jump_w2"], p["jump_b2"] = _init_linear(ks[8], hidden_dim // 2, 2)
    # DirectDenoiserSequenceWithRisk: concat(x, t_embed, h) -> H -> H -> heads
    din = feature_dim + time_embed_dim + cond_dim
    den = {}
    den["w1"], den["b1"] = _init_linear(ks[9], din, hidden_dim)
    den["w2"], den["b2"] = _init_linear(ks[10], hidden_dim, hidden_dim)
    den["wx0"], den["bx0"] = _init_linear(ks[11], hidden_dim, feature_dim)
    den["wls"], den["bls"] = _init_linear(ks[12], hidden_dim, feature_dim)
    p["denoiser"] = den
    return p


def _fuse_conv_weights(p, cin):
    """Fold k=1 and k=3 conv weights into the k=5 tap layout (same-padding
    conv == 5-tap matmul with the narrower kernels zero-padded)."""
    w = p["conv5_w"]
    w = w.at[1 * cin:4 * cin].add(p["conv3_w"])   # offsets -1,0,+1
    w = w.at[2 * cin:3 * cin].add(p["conv1_w"])   # offset 0
    b = p["conv1_b"] + p["conv3_b"] + p["conv5_b"]
    return w, b


def prepare_params(p, *, cond_input_dim, feature_dim, time_embed_dim):
    """One-time: conv fusion, w1 row-split, head merge, bf16 weight casts."""
    bf = lambda a: a.astype(jnp.bfloat16)
    rb = lambda a: a.reshape(1, -1)               # biases -> (1, N), kept f32
    conv_w, conv_b = _fuse_conv_weights(p, cond_input_dim)
    den = p["denoiser"]
    F, Td = feature_dim, time_embed_dim
    w1 = den["w1"]
    return {
        "conv_w": bf(conv_w), "conv_b": rb(conv_b),
        "ff1_w": bf(p["enc_ff1_w"]), "ff1_b": rb(p["enc_ff1_b"]),
        "ff2_w": bf(p["enc_ff2_w"]), "ff2_b": rb(p["enc_ff2_b"]),
        "enc_out_w": bf(p["enc_out_w"]), "enc_out_b": rb(p["enc_out_b"]),
        "jump_w1": bf(p["jump_w1"]), "jump_b1": rb(p["jump_b1"]),
        "jump_w2": bf(p["jump_w2"]), "jump_b2": rb(p["jump_b2"]),
        "temb_w": bf(p["temb_w"]), "temb_b": rb(p["temb_b"]),
        "w1x": bf(w1[:F]),
        "w1t": bf(w1[F:F + Td]),
        "w1h": bf(w1[F + Td:]),
        "b1": rb(den["b1"]),
        "w2": bf(den["w2"]), "b2": rb(den["b2"]),
        "whead": bf(jnp.concatenate([den["wx0"], den["wls"]], axis=1)),
        "bhead": rb(jnp.concatenate([den["bx0"], den["bls"]])),
    }


def cosine_alpha_bars(T, s_base=0.008, alpha=1.0):
    steps = jnp.arange(T + 1, dtype=jnp.float32)
    f = jnp.cos(((steps / T) + s_base) / (1.0 + s_base) * (jnp.pi / 2.0)) ** 2
    ab = alpha * f / f[0]
    return jnp.clip(ab[1:], 1e-5, 1.0)            # alpha_bar_t for t = 0..T-1


# ----------------------------------------------------------------------------
# Main
# ----------------------------------------------------------------------------

if __name__ == "__main__":
    # Hyperparameters (small, consistent with the module constructor)
    seq_len, feature_dim = 8, 4
    cond_seq_len, cond_input_dim = 12, 6
    cond_dim, time_embed_dim, hidden_dim = 16, 16, 32
    T = 100
    B = 2

    root = jax.random.PRNGKey(0)
    k_params, k_x0, k_c, k_t, k_fwd = jax.random.split(root, 5)

    params = init_params(
        k_params, feature_dim=feature_dim, cond_input_dim=cond_input_dim,
        cond_dim=cond_dim, time_embed_dim=time_embed_dim, hidden_dim=hidden_dim)
    prep = prepare_params(
        params, cond_input_dim=cond_input_dim, feature_dim=feature_dim,
        time_embed_dim=time_embed_dim)
    alpha_bars = cosine_alpha_bars(T, s_base=0.008, alpha=1.0)

    x0 = jax.random.normal(k_x0, (B, seq_len, feature_dim), dtype=jnp.float32)
    c = jax.random.normal(k_c, (B, cond_seq_len, cond_input_dim),
                          dtype=jnp.float32)
    t = jax.random.randint(k_t, (B,), 0, T)

    fwd = jax.jit(model_forward)
    x0_pred, log_sigma = fwd(prep, alpha_bars, x0, c, t, k_fwd)
    jax.block_until_ready((x0_pred, log_sigma))

    assert x0_pred.shape == (B, seq_len, feature_dim)
    assert log_sigma.shape == (B, seq_len, feature_dim)
    assert bool(jnp.all(jnp.isfinite(x0_pred)))
    assert bool(jnp.all(jnp.isfinite(log_sigma)))
    print("KERNEL_OK")
</pallas_src>

<mosaic_0001>
module attributes {stable_mosaic.version = 11 : i64} {
  func.func @_fused_forward_kernel(%arg0: i32, %arg1: memref<2xf32, #tpu.memory_space<smem>>, %arg2: memref<2xf32, #tpu.memory_space<smem>>, %arg3: memref<1x16x6xf32, #tpu.memory_space<vmem>>, %arg4: memref<1x1x16xf32, #tpu.memory_space<vmem>>, %arg5: memref<1x8x4xf32, #tpu.memory_space<vmem>>, %arg6: memref<1x8x4xf32, #tpu.memory_space<vmem>>, %arg7: memref<1x8x4xf32, #tpu.memory_space<vmem>>, %arg8: memref<30x32xbf16, #tpu.memory_space<vmem>>, %arg9: memref<1x32xf32, #tpu.memory_space<vmem>>, %arg10: memref<32x32xbf16, #tpu.memory_space<vmem>>, %arg11: memref<1x32xf32, #tpu.memory_space<vmem>>, %arg12: memref<32x32xbf16, #tpu.memory_space<vmem>>, %arg13: memref<1x32xf32, #tpu.memory_space<vmem>>, %arg14: memref<32x16xbf16, #tpu.memory_space<vmem>>, %arg15: memref<1x16xf32, #tpu.memory_space<vmem>>, %arg16: memref<16x16xbf16, #tpu.memory_space<vmem>>, %arg17: memref<1x16xf32, #tpu.memory_space<vmem>>, %arg18: memref<16x2xbf16, #tpu.memory_space<vmem>>, %arg19: memref<1x2xf32, #tpu.memory_space<vmem>>, %arg20: memref<16x16xbf16, #tpu.memory_space<vmem>>, %arg21: memref<1x16xf32, #tpu.memory_space<vmem>>, %arg22: memref<4x32xbf16, #tpu.memory_space<vmem>>, %arg23: memref<16x32xbf16, #tpu.memory_space<vmem>>, %arg24: memref<16x32xbf16, #tpu.memory_space<vmem>>, %arg25: memref<1x32xf32, #tpu.memory_space<vmem>>, %arg26: memref<32x32xbf16, #tpu.memory_space<vmem>>, %arg27: memref<1x32xf32, #tpu.memory_space<vmem>>, %arg28: memref<32x8xbf16, #tpu.memory_space<vmem>>, %arg29: memref<1x8xf32, #tpu.memory_space<vmem>>, %arg30: memref<1x8x8xf32, #tpu.memory_space<vmem>>) attributes {dimension_semantics = [#tpu.dimension_semantics<parallel>], iteration_bounds = array<i64: 2>, scalar_prefetch = 0 : i64, scratch_operands = 0 : i64, tpu.core_type = #tpu.core_type<tc>, window_params = [{transform_indices = @transform_0, window_bounds = array<i64: 2>}, {transform_indices = @transform_1, window_bounds = array<i64: 2>}, {transform_indices = @transform_2, window_bounds = array<i64: 1, 16, 6>}, {transform_indices = @transform_3, window_bounds = array<i64: 1, 1, 16>}, {transform_indices = @transform_4, window_bounds = array<i64: 1, 8, 4>}, {transform_indices = @transform_5, window_bounds = array<i64: 1, 8, 4>}, {transform_indices = @transform_6, window_bounds = array<i64: 1, 8, 4>}, {pipeline_mode = #tpu.pipeline_mode<synchronous>, transform_indices = @transform_7, window_bounds = array<i64: 30, 32>}, {pipeline_mode = #tpu.pipeline_mode<synchronous>, transform_indices = @transform_8, window_bounds = array<i64: 1, 32>}, {pipeline_mode = #tpu.pipeline_mode<synchronous>, transform_indices = @transform_9, window_bounds = array<i64: 32, 32>}, {pipeline_mode = #tpu.pipeline_mode<synchronous>, transform_indices = @transform_10, window_bounds = array<i64: 1, 32>}, {pipeline_mode = #tpu.pipeline_mode<synchronous>, transform_indices = @transform_11, window_bounds = array<i64: 32, 32>}, {pipeline_mode = #tpu.pipeline_mode<synchronous>, transform_indices = @transform_12, window_bounds = array<i64: 1, 32>}, {pipeline_mode = #tpu.pipeline_mode<synchronous>, transform_indices = @transform_13, window_bounds = array<i64: 32, 16>}, {pipeline_mode = #tpu.pipeline_mode<synchronous>, transform_indices = @transform_14, window_bounds = array<i64: 1, 16>}, {pipeline_mode = #tpu.pipeline_mode<synchronous>, transform_indices = @transform_15, window_bounds = array<i64: 16, 16>}, {pipeline_mode = #tpu.pipeline_mode<synchronous>, transform_indices = @transform_16, window_bounds = array<i64: 1, 16>}, {pipeline_mode = #tpu.pipeline_mode<synchronous>, transform_indices = @transform_17, window_bounds = array<i64: 16, 2>}, {pipeline_mode = #tpu.pipeline_mode<synchronous>, transform_indices = @transform_18, window_bounds = array<i64: 1, 2>}, {pipeline_mode = #tpu.pipeline_mode<synchronous>, transform_indices = @transform_19, window_bounds = array<i64: 16, 16>}, {pipeline_mode = #tpu.pipeline_mode<synchronous>, transform_indices = @transform_20, window_bounds = array<i64: 1, 16>}, {pipeline_mode = #tpu.pipeline_mode<synchronous>, transform_indices = @transform_21, window_bounds = array<i64: 4, 32>}, {pipeline_mode = #tpu.pipeline_mode<synchronous>, transform_indices = @transform_22, window_bounds = array<i64: 16, 32>}, {pipeline_mode = #tpu.pipeline_mode<synchronous>, transform_indices = @transform_23, window_bounds = array<i64: 16, 32>}, {pipeline_mode = #tpu.pipeline_mode<synchronous>, transform_indices = @transform_24, window_bounds = array<i64: 1, 32>}, {pipeline_mode = #tpu.pipeline_mode<synchronous>, transform_indices = @transform_25, window_bounds = array<i64: 32, 32>}, {pipeline_mode = #tpu.pipeline_mode<synchronous>, transform_indices = @transform_26, window_bounds = array<i64: 1, 32>}, {pipeline_mode = #tpu.pipeline_mode<synchronous>, transform_indices = @transform_27, window_bounds = array<i64: 32, 8>}, {pipeline_mode = #tpu.pipeline_mode<synchronous>, transform_indices = @transform_28, window_bounds = array<i64: 1, 8>}, {transform_indices = @transform_29, window_bounds = array<i64: 1, 8, 8>}]} {
    %c0 = arith.constant 0 : index
    %c0_0 = arith.constant 0 : index
    %c0_1 = arith.constant 0 : index
    %0 = vector.load %arg3[%c0, %c0_0, %c0_1] : memref<1x16x6xf32, #tpu.memory_space<vmem>>, vector<1x12x6xf32>
    %1 = vector.shape_cast %0 : vector<1x12x6xf32> to vector<12x6xf32>
    %c0_2 = arith.constant 0 : index
    %c1 = arith.constant 1 : index
    %c0_3 = arith.constant 0 : index
    %2 = vector.load %arg3[%c0_2, %c1, %c0_3] : memref<1x16x6xf32, #tpu.memory_space<vmem>>, vector<1x12x6xf32>
    %3 = vector.shape_cast %2 : vector<1x12x6xf32> to vector<12x6xf32>
    %c0_4 = arith.constant 0 : index
    %c2 = arith.constant 2 : index
    %c0_5 = arith.constant 0 : index
    %4 = vector.load %arg3[%c0_4, %c2, %c0_5] : memref<1x16x6xf32, #tpu.memory_space<vmem>>, vector<1x12x6xf32>
    %5 = vector.shape_cast %4 : vector<1x12x6xf32> to vector<12x6xf32>
    %c0_6 = arith.constant 0 : index
    %c3 = arith.constant 3 : index
    %c0_7 = arith.constant 0 : index
    %6 = vector.load %arg3[%c0_6, %c3, %c0_7] : memref<1x16x6xf32, #tpu.memory_space<vmem>>, vector<1x12x6xf32>
    %7 = vector.shape_cast %6 : vector<1x12x6xf32> to vector<12x6xf32>
    %c0_8 = arith.constant 0 : index
    %c4 = arith.constant 4 : index
    %c0_9 = arith.constant 0 : index
    %8 = vector.load %arg3[%c0_8, %c4, %c0_9] : memref<1x16x6xf32, #tpu.memory_space<vmem>>, vector<1x12x6xf32>
    %9 = vector.shape_cast %8 : vector<1x12x6xf32> to vector<12x6xf32>
    %10 = tpu.concatenate %1, %3, %5, %7, %9 in 1 : vector<12x6xf32>, vector<12x6xf32>, vector<12x6xf32>, vector<12x6xf32>, vector<12x6xf32> -> vector<12x30xf32>
    %11 = arith.truncf %10 : vector<12x30xf32> to vector<12x30xbf16>
    %c0_10 = arith.constant 0 : index
    %c0_11 = arith.constant 0 : index
    %12 = vector.load %arg8[%c0_10, %c0_11] : memref<30x32xbf16, #tpu.memory_space<vmem>>, vector<30x32xbf16>
    %cst = arith.constant dense<0.000000e+00> : vector<12x32xf32>
    %13 = tpu.matmul %11, %12, %cst {dimension_numbers = #tpu.dot_dimension_numbers<[1], [0], [0], [1], [0, 0, 1, 1], [], []>} : vector<12x30xbf16>, vector<30x32xbf16>, vector<12x32xf32> -> vector<12x32xf32>
    %c0_12 = arith.constant 0 : index
    %c0_13 = arith.constant 0 : index
    %14 = vector.load %arg9[%c0_12, %c0_13] : memref<1x32xf32, #tpu.memory_space<vmem>>, vector<1x32xf32>
    %15 = vector.broadcast %14 : vector<1x32xf32> to vector<12x32xf32>
    %16 = arith.addf %13, %15 : vector<12x32xf32>
    %cst_14 = arith.constant 0.000000e+00 : f32
    %17 = vector.broadcast %cst_14 : f32 to vector<12x32xf32>
    %18 = arith.maximumf %16, %17 : vector<12x32xf32>
    %19 = arith.truncf %18 : vector<12x32xf32> to vector<12x32xbf16>
    %c0_15 = arith.constant 0 : index
    %c0_16 = arith.constant 0 : index
    %20 = vector.load %arg10[%c0_15, %c0_16] : memref<32x32xbf16, #tpu.memory_space<vmem>>, vector<32x32xbf16>
    %cst_17 = arith.constant dense<0.000000e+00> : vector<12x32xf32>
    %21 = tpu.matmul %19, %20, %cst_17 {dimension_numbers = #tpu.dot_dimension_numbers<[1], [0], [0], [1], [0, 0, 1, 1], [], []>} : vector<12x32xbf16>, vector<32x32xbf16>, vector<12x32xf32> -> vector<12x32xf32>
    %c0_18 = arith.constant 0 : index
    %c0_19 = arith.constant 0 : index
    %22 = vector.load %arg11[%c0_18, %c0_19] : memref<1x32xf32, #tpu.memory_space<vmem>>, vector<1x32xf32>
    %23 = vector.broadcast %22 : vector<1x32xf32> to vector<12x32xf32>
    %24 = arith.addf %21, %23 : vector<12x32xf32>
    %cst_20 = arith.constant 0.000000e+00 : f32
    %25 = vector.broadcast %cst_20 : f32 to vector<12x32xf32>
    %26 = arith.maximumf %24, %25 : vector<12x32xf32>
    %27 = arith.truncf %26 : vector<12x32xf32> to vector<12x32xbf16>
    %c0_21 = arith.constant 0 : index
    %c0_22 = arith.constant 0 : index
    %28 = vector.load %arg12[%c0_21, %c0_22] : memref<32x32xbf16, #tpu.memory_space<vmem>>, vector<32x32xbf16>
    %cst_23 = arith.constant dense<0.000000e+00> : vector<12x32xf32>
    %29 = tpu.matmul %27, %28, %cst_23 {dimension_numbers = #tpu.dot_dimension_numbers<[1], [0], [0], [1], [0, 0, 1, 1], [], []>} : vector<12x32xbf16>, vector<32x32xbf16>, vector<12x32xf32> -> vector<12x32xf32>
    %c0_24 = arith.constant 0 : index
    %c0_25 = arith.constant 0 : index
    %30 = vector.load %arg13[%c0_24, %c0_25] : memref<1x32xf32, #tpu.memory_space<vmem>>, vector<1x32xf32>
    %31 = vector.broadcast %30 : vector<1x32xf32> to vector<12x32xf32>
    %32 = arith.addf %29, %31 : vector<12x32xf32>
    %cst_26 = arith.constant 0.000000e+00 : f32
    %33 = vector.broadcast %cst_26 : f32 to vector<12x32xf32>
    %34 = arith.maximumf %32, %33 : vector<12x32xf32>
    %cst_27 = arith.constant dense<0.000000e+00> : vector<32xf32>
    %35 = vector.multi_reduction <add>, %34, %cst_27 [0] : vector<12x32xf32> to vector<32xf32>
    %36 = vector.shape_cast %35 : vector<32xf32> to vector<1x32xf32>
    %cst_28 = arith.constant 0.0833333358 : f32
    %37 = vector.broadcast %cst_28 : f32 to vector<1x32xf32>
    %38 = arith.mulf %36, %37 : vector<1x32xf32>
    %39 = arith.truncf %38 : vector<1x32xf32> to vector<1x32xbf16>
    %c0_29 = arith.constant 0 : index
    %c0_30 = arith.constant 0 : index
    %40 = vector.load %arg14[%c0_29, %c0_30] : memref<32x16xbf16, #tpu.memory_space<vmem>>, vector<32x16xbf16>
    %cst_31 = arith.constant dense<0.000000e+00> : vector<1x16xf32>
    %41 = tpu.matmul %39, %40, %cst_31 {dimension_numbers = #tpu.dot_dimension_numbers<[1], [0], [0], [1], [0, 0, 1, 1], [], []>} : vector<1x32xbf16>, vector<32x16xbf16>, vector<1x16xf32> -> vector<1x16xf32>
    %c0_32 = arith.constant 0 : index
    %c0_33 = arith.constant 0 : index
    %42 = vector.load %arg15[%c0_32, %c0_33] : memref<1x16xf32, #tpu.memory_space<vmem>>, vector<1x16xf32>
    %43 = arith.addf %41, %42 : vector<1x16xf32>
    %44 = arith.truncf %43 : vector<1x16xf32> to vector<1x16xbf16>
    %c0_34 = arith.constant 0 : index
    %c0_35 = arith.constant 0 : index
    %45 = vector.load %arg16[%c0_34, %c0_35] : memref<16x16xbf16, #tpu.memory_space<vmem>>, vector<16x16xbf16>
    %cst_36 = arith.constant dense<0.000000e+00> : vector<1x16xf32>
    %46 = tpu.matmul %44, %45, %cst_36 {dimension_numbers = #tpu.dot_dimension_numbers<[1], [0], [0], [1], [0, 0, 1, 1], [], []>} : vector<1x16xbf16>, vector<16x16xbf16>, vector<1x16xf32> -> vector<1x16xf32>
    %c0_37 = arith.constant 0 : index
    %c0_38 = arith.constant 0 : index
    %47 = vector.load %arg17[%c0_37, %c0_38] : memref<1x16xf32, #tpu.memory_space<vmem>>, vector<1x16xf32>
    %48 = arith.addf %46, %47 : vector<1x16xf32>
    %cst_39 = arith.constant 0.000000e+00 : f32
    %49 = vector.broadcast %cst_39 : f32 to vector<1x16xf32>
    %50 = arith.maximumf %48, %49 : vector<1x16xf32>
    %51 = arith.truncf %50 : vector<1x16xf32> to vector<1x16xbf16>
    %c0_40 = arith.constant 0 : index
    %c0_41 = arith.constant 0 : index
    %52 = vector.load %arg18[%c0_40, %c0_41] : memref<16x2xbf16, #tpu.memory_space<vmem>>, vector<16x2xbf16>
    %cst_42 = arith.constant dense<0.000000e+00> : vector<1x2xf32>
    %53 = tpu.matmul %51, %52, %cst_42 {dimension_numbers = #tpu.dot_dimension_numbers<[1], [0], [0], [1], [0, 0, 1, 1], [], []>} : vector<1x16xbf16>, vector<16x2xbf16>, vector<1x2xf32> -> vector<1x2xf32>
    %c0_43 = arith.constant 0 : index
    %c0_44 = arith.constant 0 : index
    %54 = vector.load %arg19[%c0_43, %c0_44] : memref<1x2xf32, #tpu.memory_space<vmem>>, vector<1x2xf32>
    %55 = arith.addf %53, %54 : vector<1x2xf32>
    %56 = vector.extract_strided_slice %55 {offsets = [0, 0], sizes = [1, 1], strides = [1, 1]} : vector<1x2xf32> to vector<1x1xf32>
    %cst_45 = arith.constant 0.000000e+00 : f32
    %57 = vector.broadcast %cst_45 : f32 to vector<1x1xf32>
    %58 = arith.subf %57, %56 : vector<1x1xf32>
    %59 = math.exp %58 : vector<1x1xf32>
    %cst_46 = arith.constant 1.000000e+00 : f32
    %60 = vector.broadcast %cst_46 : f32 to vector<1x1xf32>
    %61 = arith.addf %60, %59 : vector<1x1xf32>
    %cst_47 = arith.constant 1.000000e+00 : f32
    %62 = vector.broadcast %cst_47 : f32 to vector<1x1xf32>
    %63 = arith.divf %62, %61 : vector<1x1xf32>
    %64 = vector.extract_strided_slice %55 {offsets = [0, 1], sizes = [1, 1], strides = [1, 1]} : vector<1x2xf32> to vector<1x1xf32>
    %65 = math.exp %64 : vector<1x1xf32>
    %cst_48 = arith.constant 1.000000e+00 : f32
    %66 = vector.broadcast %cst_48 : f32 to vector<1x1xf32>
    %67 = arith.addf %66, %65 : vector<1x1xf32>
    %68 = math.log %67 : vector<1x1xf32>
    %69 = arith.index_cast %arg0 : i32 to index
    %70 = memref.load %arg2[%69] : memref<2xf32, #tpu.memory_space<smem>>
    %71 = vector.broadcast %70 : f32 to vector<1x1xf32>
    %72 = arith.cmpf olt, %71, %63 : vector<1x1xf32>
    %cst_49 = arith.constant 0.000000e+00 : f32
    %73 = vector.broadcast %cst_49 : f32 to vector<1x1xf32>
    %74 = arith.select %72, %68, %73 : vector<1x1xi1>, vector<1x1xf32>
    %75 = arith.index_cast %arg0 : i32 to index
    %76 = memref.load %arg1[%75] : memref<2xf32, #tpu.memory_space<smem>>
    %77 = vector.broadcast %76 : f32 to vector<1x1xf32>
    %78 = math.sqrt %77 : vector<1x1xf32>
    %cst_50 = arith.constant 1.000000e+00 : f32
    %79 = vector.broadcast %cst_50 : f32 to vector<1x1xf32>
    %80 = arith.subf %79, %77 : vector<1x1xf32>
    %cst_51 = arith.constant 0.000000e+00 : f32
    %81 = vector.broadcast %cst_51 : f32 to vector<1x1xf32>
    %82 = arith.maximumf %80, %81 : vector<1x1xf32>
    %83 = math.sqrt %82 : vector<1x1xf32>
    %c0_52 = arith.constant 0 : index
    %c0_53 = arith.constant 0 : index
    %c0_54 = arith.constant 0 : index
    %84 = vector.load %arg5[%c0_52, %c0_53, %c0_54] : memref<1x8x4xf32, #tpu.memory_space<vmem>>, vector<1x8x4xf32>
    %85 = vector.shape_cast %84 : vector<1x8x4xf32> to vector<8x4xf32>
    %86 = vector.broadcast %78 : vector<1x1xf32> to vector<8x4xf32>
    %87 = arith.mulf %86, %85 : vector<8x4xf32>
    %c0_55 = arith.constant 0 : index
    %c0_56 = arith.constant 0 : index
    %c0_57 = arith.constant 0 : index
    %88 = vector.load %arg6[%c0_55, %c0_56, %c0_57] : memref<1x8x4xf32, #tpu.memory_space<vmem>>, vector<1x8x4xf32>
    %89 = vector.shape_cast %88 : vector<1x8x4xf32> to vector<8x4xf32>
    %90 = vector.broadcast %83 : vector<1x1xf32> to vector<8x4xf32>
    %91 = arith.mulf %90, %89 : vector<8x4xf32>
    %92 = arith.addf %87, %91 : vector<8x4xf32>
    %c0_58 = arith.constant 0 : index
    %c0_59 = arith.constant 0 : index
    %c0_60 = arith.constant 0 : index
    %93 = vector.load %arg7[%c0_58, %c0_59, %c0_60] : memref<1x8x4xf32, #tpu.memory_space<vmem>>, vector<1x8x4xf32>
    %94 = vector.shape_cast %93 : vector<1x8x4xf32> to vector<8x4xf32>
    %95 = vector.broadcast %74 : vector<1x1xf32> to vector<8x4xf32>
    %96 = arith.mulf %95, %94 : vector<8x4xf32>
    %97 = arith.addf %92, %96 : vector<8x4xf32>
    %c0_61 = arith.constant 0 : index
    %c0_62 = arith.constant 0 : index
    %c0_63 = arith.constant 0 : index
    %98 = vector.load %arg4[%c0_61, %c0_62, %c0_63] : memref<1x1x16xf32, #tpu.memory_space<vmem>>, vector<1x1x16xf32>
    %99 = vector.shape_cast %98 : vector<1x1x16xf32> to vector<1x16xf32>
    %100 = arith.truncf %99 : vector<1x16xf32> to vector<1x16xbf16>
    %c0_64 = arith.constant 0 : index
    %c0_65 = arith.constant 0 : index
    %101 = vector.load %arg20[%c0_64, %c0_65] : memref<16x16xbf16, #tpu.memory_space<vmem>>, vector<16x16xbf16>
    %cst_66 = arith.constant dense<0.000000e+00> : vector<1x16xf32>
    %102 = tpu.matmul %100, %101, %cst_66 {dimension_numbers = #tpu.dot_dimension_numbers<[1], [0], [0], [1], [0, 0, 1, 1], [], []>} : vector<1x16xbf16>, vector<16x16xbf16>, vector<1x16xf32> -> vector<1x16xf32>
    %c0_67 = arith.constant 0 : index
    %c0_68 = arith.constant 0 : index
    %103 = vector.load %arg21[%c0_67, %c0_68] : memref<1x16xf32, #tpu.memory_space<vmem>>, vector<1x16xf32>
    %104 = arith.addf %102, %103 : vector<1x16xf32>
    %cst_69 = arith.constant 0.000000e+00 : f32
    %105 = vector.broadcast %cst_69 : f32 to vector<1x16xf32>
    %106 = arith.subf %105, %104 : vector<1x16xf32>
    %107 = math.exp %106 : vector<1x16xf32>
    %cst_70 = arith.constant 1.000000e+00 : f32
    %108 = vector.broadcast %cst_70 : f32 to vector<1x16xf32>
    %109 = arith.addf %108, %107 : vector<1x16xf32>
    %cst_71 = arith.constant 1.000000e+00 : f32
    %110 = vector.broadcast %cst_71 : f32 to vector<1x16xf32>
    %111 = arith.divf %110, %109 : vector<1x16xf32>
    %112 = arith.mulf %104, %111 : vector<1x16xf32>
    %113 = arith.truncf %112 : vector<1x16xf32> to vector<1x16xbf16>
    %c0_72 = arith.constant 0 : index
    %c0_73 = arith.constant 0 : index
    %114 = vector.load %arg23[%c0_72, %c0_73] : memref<16x32xbf16, #tpu.memory_space<vmem>>, vector<16x32xbf16>
    %cst_74 = arith.constant dense<0.000000e+00> : vector<1x32xf32>
    %115 = tpu.matmul %113, %114, %cst_74 {dimension_numbers = #tpu.dot_dimension_numbers<[1], [0], [0], [1], [0, 0, 1, 1], [], []>} : vector<1x16xbf16>, vector<16x32xbf16>, vector<1x32xf32> -> vector<1x32xf32>
    %116 = arith.truncf %43 : vector<1x16xf32> to vector<1x16xbf16>
    %c0_75 = arith.constant 0 : index
    %c0_76 = arith.constant 0 : index
    %117 = vector.load %arg24[%c0_75, %c0_76] : memref<16x32xbf16, #tpu.memory_space<vmem>>, vector<16x32xbf16>
    %cst_77 = arith.constant dense<0.000000e+00> : vector<1x32xf32>
    %118 = tpu.matmul %116, %117, %cst_77 {dimension_numbers = #tpu.dot_dimension_numbers<[1], [0], [0], [1], [0, 0, 1, 1], [], []>} : vector<1x16xbf16>, vector<16x32xbf16>, vector<1x32xf32> -> vector<1x32xf32>
    %119 = arith.addf %115, %118 : vector<1x32xf32>
    %c0_78 = arith.constant 0 : index
    %c0_79 = arith.constant 0 : index
    %120 = vector.load %arg25[%c0_78, %c0_79] : memref<1x32xf32, #tpu.memory_space<vmem>>, vector<1x32xf32>
    %121 = arith.addf %119, %120 : vector<1x32xf32>
    %122 = arith.truncf %97 : vector<8x4xf32> to vector<8x4xbf16>
    %c0_80 = arith.constant 0 : index
    %c0_81 = arith.constant 0 : index
    %123 = vector.load %arg22[%c0_80, %c0_81] : memref<4x32xbf16, #tpu.memory_space<vmem>>, vector<4x32xbf16>
    %cst_82 = arith.constant dense<0.000000e+00> : vector<8x32xf32>
    %124 = tpu.matmul %122, %123, %cst_82 {dimension_numbers = #tpu.dot_dimension_numbers<[1], [0], [0], [1], [0, 0, 1, 1], [], []>} : vector<8x4xbf16>, vector<4x32xbf16>, vector<8x32xf32> -> vector<8x32xf32>
    %125 = vector.broadcast %121 : vector<1x32xf32> to vector<8x32xf32>
    %126 = arith.addf %124, %125 : vector<8x32xf32>
    %cst_83 = arith.constant 0.000000e+00 : f32
    %127 = vector.broadcast %cst_83 : f32 to vector<8x32xf32>
    %128 = arith.maximumf %126, %127 : vector<8x32xf32>
    %129 = arith.truncf %128 : vector<8x32xf32> to vector<8x32xbf16>
    %c0_84 = arith.constant 0 : index
    %c0_85 = arith.constant 0 : index
    %130 = vector.load %arg26[%c0_84, %c0_85] : memref<32x32xbf16, #tpu.memory_space<vmem>>, vector<32x32xbf16>
    %cst_86 = arith.constant dense<0.000000e+00> : vector<8x32xf32>
    %131 = tpu.matmul %129, %130, %cst_86 {dimension_numbers = #tpu.dot_dimension_numbers<[1], [0], [0], [1], [0, 0, 1, 1], [], []>} : vector<8x32xbf16>, vector<32x32xbf16>, vector<8x32xf32> -> vector<8x32xf32>
    %c0_87 = arith.constant 0 : index
    %c0_88 = arith.constant 0 : index
    %132 = vector.load %arg27[%c0_87, %c0_88] : memref<1x32xf32, #tpu.memory_space<vmem>>, vector<1x32xf32>
    %133 = vector.broadcast %132 : vector<1x32xf32> to vector<8x32xf32>
    %134 = arith.addf %131, %133 : vector<8x32xf32>
    %cst_89 = arith.constant 0.000000e+00 : f32
    %135 = vector.broadcast %cst_89 : f32 to vector<8x32xf32>
    %136 = arith.maximumf %134, %135 : vector<8x32xf32>
    %137 = arith.truncf %136 : vector<8x32xf32> to vector<8x32xbf16>
    %c0_90 = arith.constant 0 : index
    %c0_91 = arith.constant 0 : index
    %138 = vector.load %arg28[%c0_90, %c0_91] : memref<32x8xbf16, #tpu.memory_space<vmem>>, vector<32x8xbf16>
    %cst_92 = arith.constant dense<0.000000e+00> : vector<8x8xf32>
    %139 = tpu.matmul %137, %138, %cst_92 {dimension_numbers = #tpu.dot_dimension_numbers<[1], [0], [0], [1], [0, 0, 1, 1], [], []>} : vector<8x32xbf16>, vector<32x8xbf16>, vector<8x8xf32> -> vector<8x8xf32>
    %c0_93 = arith.constant 0 : index
    %c0_94 = arith.constant 0 : index
    %140 = vector.load %arg29[%c0_93, %c0_94] : memref<1x8xf32, #tpu.memory_space<vmem>>, vector<1x8xf32>
    %141 = vector.broadcast %140 : vector<1x8xf32> to vector<8x8xf32>
    %142 = arith.addf %139, %141 : vector<8x8xf32>
    %c0_95 = arith.constant 0 : index
    %c0_96 = arith.constant 0 : index
    %c0_97 = arith.constant 0 : index
    %143 = vector.load %arg30[%c0_95, %c0_96, %c0_97] : memref<1x8x8xf32, #tpu.memory_space<vmem>>, vector<1x8x8xf32>
    %144 = vector.shape_cast %143 : vector<1x8x8xf32> to vector<8x8xf32>
    %145 = vector.shape_cast %142 : vector<8x8xf32> to vector<1x8x8xf32>
    tpu.vector_store %arg30[%c0_95, %c0_96, %c0_97], %145 {strides = array<i32>} : memref<1x8x8xf32, #tpu.memory_space<vmem>>, vector<1x8x8xf32>,
    return
  }
  func.func @transform_0(%arg0: i32) -> i32 {
    %c0_i32 = arith.constant 0 : i32
    %c0_i32_0 = arith.constant 0 : i32
    return %c0_i32 : i32
  }
  func.func @transform_1(%arg0: i32) -> i32 {
    %c0_i32 = arith.constant 0 : i32
    %c0_i32_0 = arith.constant 0 : i32
    return %c0_i32 : i32
  }
  func.func @transform_2(%arg0: i32) -> (i32, i32, i32) {
    %c0_i32 = arith.constant 0 : i32
    %c0_i32_0 = arith.constant 0 : i32
    %c0_i32_1 = arith.constant 0 : i32
    return %arg0, %c0_i32, %c0_i32_0 : i32, i32, i32
  }
  func.func @transform_3(%arg0: i32) -> (i32, i32, i32) {
    %c0_i32 = arith.constant 0 : i32
    %c0_i32_0 = arith.constant 0 : i32
    %c0_i32_1 = arith.constant 0 : i32
    return %arg0, %c0_i32, %c0_i32_0 : i32, i32, i32
  }
  func.func @transform_4(%arg0: i32) -> (i32, i32, i32) {
    %c0_i32 = arith.constant 0 : i32
    %c0_i32_0 = arith.constant 0 : i32
    %c0_i32_1 = arith.constant 0 : i32
    return %arg0, %c0_i32, %c0_i32_0 : i32, i32, i32
  }
  func.func @transform_5(%arg0: i32) -> (i32, i32, i32) {
    %c0_i32 = arith.constant 0 : i32
    %c0_i32_0 = arith.constant 0 : i32
    %c0_i32_1 = arith.constant 0 : i32
    return %arg0, %c0_i32, %c0_i32_0 : i32, i32, i32
  }
  func.func @transform_6(%arg0: i32) -> (i32, i32, i32) {
    %c0_i32 = arith.constant 0 : i32
    %c0_i32_0 = arith.constant 0 : i32
    %c0_i32_1 = arith.constant 0 : i32
    return %arg0, %c0_i32, %c0_i32_0 : i32, i32, i32
  }
  func.func @transform_7(%arg0: i32) -> (i32, i32) {
    %c0_i32 = arith.constant 0 : i32
    %c0_i32_0 = arith.constant 0 : i32
    %c0_i32_1 = arith.constant 0 : i32
    return %c0_i32, %c0_i32_0 : i32, i32
  }
  func.func @transform_8(%arg0: i32) -> (i32, i32) {
    %c0_i32 = arith.constant 0 : i32
    %c0_i32_0 = arith.constant 0 : i32
    %c0_i32_1 = arith.constant 0 : i32
    return %c0_i32, %c0_i32_0 : i32, i32
  }
  func.func @transform_9(%arg0: i32) -> (i32, i32) {
    %c0_i32 = arith.constant 0 : i32
    %c0_i32_0 = arith.constant 0 : i32
    %c0_i32_1 = arith.constant 0 : i32
    return %c0_i32, %c0_i32_0 : i32, i32
  }
  func.func @transform_10(%arg0: i32) -> (i32, i32) {
    %c0_i32 = arith.constant 0 : i32
    %c0_i32_0 = arith.constant 0 : i32
    %c0_i32_1 = arith.constant 0 : i32
    return %c0_i32, %c0_i32_0 : i32, i32
  }
  func.func @transform_11(%arg0: i32) -> (i32, i32) {
    %c0_i32 = arith.constant 0 : i32
    %c0_i32_0 = arith.constant 0 : i32
    %c0_i32_1 = arith.constant 0 : i32
    return %c0_i32, %c0_i32_0 : i32, i32
  }
  func.func @transform_12(%arg0: i32) -> (i32, i32) {
    %c0_i32 = arith.constant 0 : i32
    %c0_i32_0 = arith.constant 0 : i32
    %c0_i32_1 = arith.constant 0 : i32
    return %c0_i32, %c0_i32_0 : i32, i32
  }
  func.func @transform_13(%arg0: i32) -> (i32, i32) {
    %c0_i32 = arith.constant 0 : i32
    %c0_i32_0 = arith.constant 0 : i32
    %c0_i32_1 = arith.constant 0 : i32
    return %c0_i32, %c0_i32_0 : i32, i32
  }
  func.func @transform_14(%arg0: i32) -> (i32, i32) {
    %c0_i32 = arith.constant 0 : i32
    %c0_i32_0 = arith.constant 0 : i32
    %c0_i32_1 = arith.constant 0 : i32
    return %c0_i32, %c0_i32_0 : i32, i32
  }
  func.func @transform_15(%arg0: i32) -> (i32, i32) {
    %c0_i32 = arith.constant 0 : i32
    %c0_i32_0 = arith.constant 0 : i32
    %c0_i32_1 = arith.constant 0 : i32
    return %c0_i32, %c0_i32_0 : i32, i32
  }
  func.func @transform_16(%arg0: i32) -> (i32, i32) {
    %c0_i32 = arith.constant 0 : i32
    %c0_i32_0 = arith.constant 0 : i32
    %c0_i32_1 = arith.constant 0 : i32
    return %c0_i32, %c0_i32_0 : i32, i32
  }
  func.func @transform_17(%arg0: i32) -> (i32, i32) {
    %c0_i32 = arith.constant 0 : i32
    %c0_i32_0 = arith.constant 0 : i32
    %c0_i32_1 = arith.constant 0 : i32
    return %c0_i32, %c0_i32_0 : i32, i32
  }
  func.func @transform_18(%arg0: i32) -> (i32, i32) {
    %c0_i32 = arith.constant 0 : i32
    %c0_i32_0 = arith.constant 0 : i32
    %c0_i32_1 = arith.constant 0 : i32
    return %c0_i32, %c0_i32_0 : i32, i32
  }
  func.func @transform_19(%arg0: i32) -> (i32, i32) {
    %c0_i32 = arith.constant 0 : i32
    %c0_i32_0 = arith.constant 0 : i32
    %c0_i32_1 = arith.constant 0 : i32
    return %c0_i32, %c0_i32_0 : i32, i32
  }
  func.func @transform_20(%arg0: i32) -> (i32, i32) {
    %c0_i32 = arith.constant 0 : i32
    %c0_i32_0 = arith.constant 0 : i32
    %c0_i32_1 = arith.constant 0 : i32
    return %c0_i32, %c0_i32_0 : i32, i32
  }
  func.func @transform_21(%arg0: i32) -> (i32, i32) {
    %c0_i32 = arith.constant 0 : i32
    %c0_i32_0 = arith.constant 0 : i32
    %c0_i32_1 = arith.constant 0 : i32
    return %c0_i32, %c0_i32_0 : i32, i32
  }
  func.func @transform_22(%arg0: i32) -> (i32, i32) {
    %c0_i32 = arith.constant 0 : i32
    %c0_i32_0 = arith.constant 0 : i32
    %c0_i32_1 = arith.constant 0 : i32
    return %c0_i32, %c0_i32_0 : i32, i32
  }
  func.func @transform_23(%arg0: i32) -> (i32, i32) {
    %c0_i32 = arith.constant 0 : i32
    %c0_i32_0 = arith.constant 0 : i32
    %c0_i32_1 = arith.constant 0 : i32
    return %c0_i32, %c0_i32_0 : i32, i32
  }
  func.func @transform_24(%arg0: i32) -> (i32, i32) {
    %c0_i32 = arith.constant 0 : i32
    %c0_i32_0 = arith.constant 0 : i32
    %c0_i32_1 = arith.constant 0 : i32
    return %c0_i32, %c0_i32_0 : i32, i32
  }
  func.func @transform_25(%arg0: i32) -> (i32, i32) {
    %c0_i32 = arith.constant 0 : i32
    %c0_i32_0 = arith.constant 0 : i32
    %c0_i32_1 = arith.constant 0 : i32
    return %c0_i32, %c0_i32_0 : i32, i32
  }
  func.func @transform_26(%arg0: i32) -> (i32, i32) {
    %c0_i32 = arith.constant 0 : i32
    %c0_i32_0 = arith.constant 0 : i32
    %c0_i32_1 = arith.constant 0 : i32
    return %c0_i32, %c0_i32_0 : i32, i32
  }
  func.func @transform_27(%arg0: i32) -> (i32, i32) {
    %c0_i32 = arith.constant 0 : i32
    %c0_i32_0 = arith.constant 0 : i32
    %c0_i32_1 = arith.constant 0 : i32
    return %c0_i32, %c0_i32_0 : i32, i32
  }
  func.func @transform_28(%arg0: i32) -> (i32, i32) {
    %c0_i32 = arith.constant 0 : i32
    %c0_i32_0 = arith.constant 0 : i32
    %c0_i32_1 = arith.constant 0 : i32
    return %c0_i32, %c0_i32_0 : i32, i32
  }
  func.func @transform_29(%arg0: i32) -> (i32, i32, i32) {
    %c0_i32 = arith.constant 0 : i32
    %c0_i32_0 = arith.constant 0 : i32
    %c0_i32_1 = arith.constant 0 : i32
    return %arg0, %c0_i32, %c0_i32_0 : i32, i32, i32
  }
}

</mosaic_0001>

<bundles_post_ra>
// kernel: model_forward.3
= control target key start
LH: loop header
LB: loop body
LE: loop exit
PB: predicated region body
PF: predicated region fallthrough
CT: control target
= control target key end

     0   :  { %s2328_s6 = smov 1   ;;  %s2329_s10 = smov 2   ;;  %s2682_s0 = inlined_call_operand.smem [shape: u32[30], index: -1, kind: input, shape index: {}] }
   0x1   :  { %s2374_s5 = sld [smem:[%s2682_s0]]   ;;  %s2330_s14 = smov 3  }
   0x2   :  { %s2379_s9 = sld [smem:[%s2682_s0 + %s2328_s6]]   ;;  %s2331_s18 = smov 4  }
   0x3   :  { %s2384_s13 = sld [smem:[%s2682_s0 + %s2329_s10]]   ;;  %s2332_s22 = smov 5  }
   0x4   :  { %s2389_s17 = sld [smem:[%s2682_s0 + %s2330_s14]]   ;;  %s2333_s26 = smov 6  }
   0x5   :  { %s2394_s21 = sld [smem:[%s2682_s0 + %s2331_s18]]   ;;  %s2334_s30 = smov 7  }
   0x6   :  { %s2399_s25 = sld [smem:[%s2682_s0 + %s2332_s22]]   ;;  %s2335_s4 = smov 8  }
   0x7   :  { %s2404_s29 = sld [smem:[%s2682_s0 + %s2333_s26]]   ;;  %s2336_s10 = smov 9  }
   0x8   :  { %s2409_s3 = sld [smem:[%s2682_s0 + %s2334_s30]]   ;;  %s2337_s15 = smov 10  }
   0x9   :  { %s2414_s8 = sld [smem:[%s2682_s0 + %s2335_s4]]   ;;  %s2338_s20 = smov 11  }
   0xa   :  { %2686 = sst [smem:[#allocation8_spill]] %s2389_s17  ;;  %s2339_s26 = smov 12  }
   0xb   :  { %2687 = sst [smem:[#allocation9_spill]] %s2394_s21  ;;  %s2340_s1 = smov 13  }
   0xc   :  { %2688 = sst [smem:[#allocation10_spill]] %s2399_s25  ;;  %s2341_s7 = smov 14  }
   0xd   :  { %2689 = sst [smem:[#allocation11_spill]] %s2404_s29  ;;  %s2343_s22 = smov 16  }
   0xe   :  { %s2419_s14 = sld [smem:[%s2682_s0 + %s2336_s10]]   ;;  %s2344_s28 = smov 17  }
   0xf   :  { %s2424_s19 = sld [smem:[%s2682_s0 + %s2337_s15]]   ;;  %s2342_s15 = smov 15  }
  0x10   :  { %s2429_s24 = sld [smem:[%s2682_s0 + %s2338_s20]]  }
  0x11   :  { %s2434_s30 = sld [smem:[%s2682_s0 + %s2339_s26]]  }
  0x12   :  { %s2439_s6 = sld [smem:[%s2682_s0 + %s2340_s1]]  }
  0x13   :  { %s2444_s12 = sld [smem:[%s2682_s0 + %s2341_s7]]   ;;  %s2345_s7 = smov 18  }
  0x14   :  { %s2449_s20 = sld [smem:[%s2682_s0 + %s2342_s15]]   ;;  %s2346_s15 = smov 19  }
  0x15   :  { %s2454_s27 = sld [smem:[%s2682_s0 + %s2343_s22]]   ;;  %s2347_s22 = smov 20  }
  0x16   :  { %s2459_s4 = sld [smem:[%s2682_s0 + %s2344_s28]]   ;;  %s2348_s28 = smov 21  }
  0x17   :  { %s2464_s29 = sld [smem:[%s2682_s0 + %s2345_s7]]   ;;  %s2349_s7 = smov 22  }
  0x18   :  { %s2469_s25 = sld [smem:[%s2682_s0 + %s2346_s15]]   ;;  %s2350_s15 = smov 23  }
  0x19   :  { %s2474_s21 = sld [smem:[%s2682_s0 + %s2347_s22]]   ;;  %s2351_s22 = smov 24  }
  0x1a   :  { %s2489_s17 = sld [smem:[%s2682_s0 + %s2350_s15]]   ;;  %s2354_s15 = smov 27  }
  0x1b   :  { %2690 = sst [smem:[#allocation12_spill]] %s2454_s27 }
  0x1c   :  { %s2479_s27 = sld [smem:[%s2682_s0 + %s2348_s28]]   ;;  %s2352_s28 = smov 25  }
  0x1d   :  { %2691 = sst [smem:[#allocation13_spill]] %s2464_s29 }
  0x1e   :  { %s2484_s29 = sld [smem:[%s2682_s0 + %s2349_s7]]   ;;  %s2353_s7 = smov 26  }
  0x1f   :  { %2692 = sst [smem:[#allocation14_spill]] %s2474_s21 }
  0x20   :  { %2695 = sst [smem:[#allocation17_spill]] %s2489_s17 }
  0x21   :  { %s2494_s21 = sld [smem:[%s2682_s0 + %s2351_s22]]   ;;  %s2355_s22 = smov 28  }
  0x22   :  { %2693 = sst [smem:[#allocation15_spill]] %s2479_s27 }
  0x23   :  { %s2499_s27 = sld [smem:[%s2682_s0 + %s2352_s28]]   ;;  %s2356_s28 = smov 29  }
  0x24   :  { %2694 = sst [smem:[#allocation16_spill]] %s2484_s29 }
  0x25   :  { %s2504_s29 = sld [smem:[%s2682_s0 + %s2353_s7]]  }
  0x26   :  { %s2509_s17 = sld [smem:[%s2682_s0 + %s2354_s15]]  }
  0x27   :  { %2696 = sst [smem:[#allocation18_spill]] %s2494_s21 }
  0x28   :  { %s2514_s21 = sld [smem:[%s2682_s0 + %s2355_s22]]  }
  0x29   :  { %2697 = sst [smem:[#allocation19_spill]] %s2499_s27 }
  0x2a   :  { %s2519_s27 = sld [smem:[%s2682_s0 + %s2356_s28]]  }
  0x2b   :  { %64 = vsyncpa [#allocation3], 0 }
  0x2c   :  { %65 = vsyncpa [#allocation5], 0  ;;  %s2521_s7 = smov 0  }
  0x2d LB: > { %s2527_s10 = sadd.s32 4294967295, %s2326_s7   ;;  %p1998_p0 = scmp.ge.s32.totalorder %s2326_s7, 1  ;;  %s2326_s7 = sphi %s2521_s7, %s71_s7  }
  0x2e   : > { %p736_p1 = scmp.lt.s32.totalorder %s2326_s7, 3  ;;  %s749_s0 = sshll.u32 %s2374_s5, 4  ;;  %s750_s0 = int_to_ptr.vmem [resolvable:$true] %s749_s0 }
  0x2f   : > { %p2684_p3 = scmp.eq.s32.totalorder %s2527_s10, 0  ;;  %s760_s15 = sshll.u32 %s2379_s9, 4  ;;  %s761_s15 = int_to_ptr.vmem [resolvable:$true] %s760_s15 }
  0x30   : > { %p2532_p2 = pnand %p1998_p0, %p736_p1  ;;  %s2282_s18 = scalar_lea.vmem %s750_s0, 16 }
  0x31   : > { %p2283_p6 = scmp.ne.s32.totalorder %s750_s0, %s2282_s18  ;;  %p2290_p10 = scmp.lt.s32.totalorder %s750_s0, %s750_s0 }
  0x32   : > { %s2698_s11 = scalar_select %p2532_p2, 1, 0 }
  0x33   : > { %p2172_p4 = pneg %p2532_p2  ;;  %p2291_p11 = scmp.lt.s32.totalorder %s2282_s18, %s2282_s18 }
  0x35   : > { %p2542_p5 = pnand %p2684_p3, %p2172_p4  ;;  %p2292_p12 = por %p2291_p11, %p2290_p10 }
  0x37   : > { %p2284_p7 = pneg %p2542_p5 }
  0x39   : > { %p2285_p8 = pnand %p2284_p7, %p2283_p6 }
  0x3b   : > { %p2286_p9 = pneg %p2285_p8 }
  0x3d   : > { %p2293_p13 = pnand %p2292_p12, %p2286_p9 }
  0x3f   : > { %2296 = shalt.err (!%p2293_p13)
}
  0x40   : > { %s2357_s22 = smov [#allocation2]   ;;  %s2297_s23 = scalar_lea.vmem %s761_s15, 16 }
  0x41   : > { %2175 = dma.vmem_to_smem (!%p2542_p5), %s750_s0, 16, %s2357_s22, [#allocation3]  }
  0x42   : > { %p2298_p0 = scmp.ne.s32.totalorder %s761_s15, %s2297_s23  ;;  %p2305_p3 = scmp.lt.s32.totalorder %s761_s15, %s761_s15 }
  0x43   : > { %p2306_p2 = scmp.lt.s32.totalorder %s2297_s23, %s2297_s23 }
  0x44   : > { %p2300_p1 = pnand %p2298_p0, %p2284_p7 }
  0x45   : > { %p2307_p6 = por %p2306_p2, %p2305_p3 }
  0x46   : > { %p2301_p4 = pneg %p2300_p1 }
  0x48   : > { %p2308_p8 = pnand %p2307_p6, %p2301_p4 }
  0x4a   : > { %2311 = shalt.err (!%p2308_p8)
}
  0x4b   : > { %s2358_s26 = smov [#allocation4]   ;;  %p2700_p9 = scmp.ne.s32.totalorder %s2698_s11, 0 }
  0x4c   : > { %2178 = dma.vmem_to_smem (!%p2542_p5), %s761_s15, 16, %s2358_s26, [#allocation5]  }
  0x4d   : > { %874 = sbr.rel (%p2700_p9) target bundleno = 2403 (0x963), region = 136  ;;  %p2701_p10 = scmp.eq.s32.totalorder (!%p2700_p9), %s2527_s10, 0 }
  0x54   : > { %2317 = dma.done.wait (%p2701_p10), [#allocation3], 16   ;;  %p2702_p11 = pmov %p2701_p10 }
  0x55   : > { %p2703_p7 = pmov %p2701_p10 }
  0x56   : > { %2319 = vsyncadd (%p2702_p11), [#allocation3], 4294967280 }
  0x57   : > { %2321 = dma.done.wait (%p2703_p7), [#allocation5], 16   ;;  %p2704_p2 = pmov %p2703_p7 }
  0x59   : > { %2323 = vsyncadd (%p2704_p2), [#allocation5], 4294967280 }
  0x5a   : > { %884 = sfence }
  0x5b   : > { %p969_p3 = scmp.lt.s32.totalorder %s2527_s10, 1  ;;  %v2249_v0 = vld [vmem:[%s2409_s3] sm:$0xff]   ;;  %v2359_v1 = vmov 0.0   ;;  %vm1075_vm0 = vcmask 1046528   ;;  %v2250_v2 = vld [vmem:[%s2409_s3 + $0x8] sm:$0x7f]  }
  0x5c   : > { %2078 = vmatprep.subr.bf16.mxu0 %v2359_v1  ;;  %2086 = vmatprep.subr.bf16.mxu1 %v2359_v1  ;;  %v1077_v3 = vsel %vm1075_vm0, %v2250_v2, 0  ;;  %vm2360_vm1 = vmmov 0   ;;  %s2361_s0 = smov 6   ;;  %s2362_s11 = smov 18   ;;  %vm1036_vm2 = vcmask 48128   ;;  %vm1039_vm3 = vcmask 97280  }
  0x5d   : > { %s2567_s28 = scalar_select %p969_p3, %s2527_s10, 1  ;;  %2079 = vmatpush3.bf16.msra.mxu0 %v2249_v0  ;;  %2082 = vmatprep.mubr.msk.bf16.mxu0 %vm2360_vm1, %v2359_v1  ;;  %vm1042_vm4 = vcmask 146432   ;;  %vm1045_vm5 = vcmask 195584   ;;  %vm1071_vm6 = vcmask 244736   ;;  %v2251_v39 = vld [vmem:[%s2419_s14] sm:$0xff]   ;;  %v2252_v40 = vld [vmem:[%s2419_s14 + $0x8] sm:$0xff]  }
  0x5e   : > { %2080 = vmatprep.subr.bf16.mxu0 %v2359_v1  ;;  %2090 = vmatprep.mubr.msk.bf16.mxu1 %vm2360_vm1, %v2359_v1  ;;  %s2363_s15 = smov 12   ;;  %s2364_s16 = smov 24   ;;  %v2011_v41 = vld [vmem:[%s2414_s8] ss:$0 sm:$0xff]  ;;  %vm1146_vm7 = vcmask 261120   ;;  %v2254_v52 = vld [vmem:[%s2429_s24 + $0x8] sm:$0xff]  }
  0x5f   : > { %s2047_s1 = sshll.u32 %s2567_s28, 4  ;;  %2087 = vmatpush3.bf16.msra.mxu1 %v2251_v39  ;;  %v2253_v51 = vld [vmem:[%s2429_s24] sm:$0xff]   ;;  %v2256_v0 = vld [vmem:[%s2439_s6 + $0x8] sm:$0xff]   ;;  %vm1264_vm8 = vcmask 257024   ;;  %s2705_s18 = sld [smem:[#allocation8_spill]]  ;;  %vm1345_vm9 = vcmask 130048  }
  0x60   : > { %s2573_s2 = scalar_lea.vmem %s2384_s13, %s2047_s1  ;;  %2088 = vmatprep.subr.bf16.mxu1 %v2359_v1  ;;  %v2015_v53 = vld [vmem:[%s2424_s19] ss:$0 sm:$0xff]  ;;  %s2706_s22 = sld [smem:[#allocation16_spill]]  ;;  %vm1665_vm10 = vcmask 1041408   ;;  %vm1661_vm0 = vcmask 31744  }
  0x61   : > { %v996_v4 = vld [vmem:[%s2573_s2 + $0x1] sm:$0xff]  ;;  %v997_v5 = vld [vmem:[%s2573_s2 + $0x9] sm:$0xf]  ;;  %2081 = vmatpush3.bf16.msra.mxu0 %v1077_v3  ;;  %v2019_v3 = vld [vmem:[%s2434_s30] ss:$0 sm:$0xff]  ;;  %s2707_s23 = sld [smem:[#allocation12_spill]] }
  0x62   : > { %v1000_v6 = vld [vmem:[%s2573_s2 + $0x3] sm:$0xff]  ;;  %v2229_v7 = vpack.i.bf16 %v997_v5, %v996_v4  ;;  %v1001_v8 = vld [vmem:[%s2573_s2 + $0xb] sm:$0xf]  ;;  %2094 = vmatprep.subr.bf16.mxu0 %v2359_v1  ;;  %s2708_s1 = sld [smem:[#allocation17_spill]] }
  0x63   : > { %v998_v9 = vld [vmem:[%s2573_s2 + $0x2] sm:$0xff]  ;;  %v999_v10 = vld [vmem:[%s2573_s2 + $0xa] sm:$0xf]  ;;  %v2239_v11 = vpack.i.bf16 %v1001_v8, %v1000_v6  ;;  %2089 = vmatpush3.bf16.msra.mxu1 %v2252_v40 }
  0x64   : > { %v1002_v12 = vld [vmem:[%s2573_s2 + $0x4] sm:$0xff]  ;;  %v1003_v13 = vld [vmem:[%s2573_s2 + $0xc] sm:$0xf]  ;;  %2230 = vrot.lane.b32.xlu0 %v2229_v7, %s2361_s0  ;;  %v2234_v14 = vpack.i.bf16 %v999_v10, %v998_v9  ;;  %2102 = vmatprep.subr.bf16.mxu1 %v2359_v1  ;;  %s2710_s0 = sld [smem:[#allocation13_spill]] }
  0x65   : > { %2240 = vrot.lane.b32.xlu1 %v2239_v11, %s2362_s11  ;;  %v2244_v15 = vpack.i.bf16 %v1003_v13, %v1002_v12  ;;  %v994_v20 = vld [vmem:[%s2573_s2] sm:$0xff]  ;;  %v995_v21 = vld [vmem:[%s2573_s2 + $0x8] sm:$0xf]  ;;  %s976_s26 = scalar_lea.vmem %s2705_s18, %s2567_s28  ;;  %s2709_s2 = sld [smem:[#allocation14_spill]] }
  0x66   : > { %v2255_v63 = vld [vmem:[%s2439_s6] sm:$0xff]   ;;  %s2711_s11 = sld [smem:[#allocation15_spill]] }
  0x67   : > { %v2257_v2 = vld [vmem:[%s2449_s20] sm:$0xff]   ;;  %s1454_s18 = sld [smem:[#allocation4 + %s2527_s10]] }
  0x68   : > { %2235 = vrot.lane.b32.xlu0 %v2234_v14, %s2363_s15  ;;  %s2712_s15 = sld [smem:[#allocation19_spill]] }
  0x69   : > { %2245 = vrot.lane.b32.xlu1 %v2244_v15, %s2364_s16  ;;  %s2365_s16 = smov 127  }
  0xd6   : > { %v2231_v16 = vpop.permute.xlu0 %2230 }
  0xd7   : > { %v2241_v17 = vpop.permute.xlu1 %2240  ;;  %v2233_v18 = vunpack.i.h.bf16 %v2231_v16  ;;  %v2232_v19 = vunpack.i.l.bf16 %v2231_v16 }
  0xd8   : > { %v2243_v23 = vunpack.i.h.bf16 %v2241_v17  ;;  %v2242_v24 = vunpack.i.l.bf16 %v2241_v17 }
  0xd9   : > { %v1037_v28 = vsel %vm1036_vm2, %v994_v20, %v2232_v19  ;;  %v1038_v29 = vsel %vm1036_vm2, %v995_v21, %v2233_v18 }
  0xda   : > { %v2236_v22 = vpop.permute.xlu0 %2235 }
  0xdb   : > { %v2238_v25 = vunpack.i.h.bf16 %v2236_v22  ;;  %v2237_v26 = vunpack.i.l.bf16 %v2236_v22  ;;  %v2246_v27 = vpop.permute.xlu1 %2245 }
  0xdc   : > { %v2248_v30 = vunpack.i.h.bf16 %v2246_v27  ;;  %v2247_v31 = vunpack.i.l.bf16 %v2246_v27 }
  0xdd   : > { %v1040_v32 = vsel %vm1039_vm3, %v1037_v28, %v2237_v26  ;;  %v1041_v33 = vsel %vm1039_vm3, %v1038_v29, %v2238_v25  ;;  %v2258_v29 = vld [vmem:[%s2469_s25] sm:$0xff]  }
  0xde   : > { %v1043_v34 = vsel %vm1042_vm4, %v1040_v32, %v2242_v24  ;;  %v1044_v35 = vsel %vm1042_vm4, %v1041_v33, %v2243_v23  ;;  %v2259_v23 = vld [vmem:[%s2459_s4] sm:$0xff]  }
  0xdf   : > { %v1046_v36 = vsel %vm1045_vm5, %v1043_v34, %v2247_v31  ;;  %v1047_v37 = vsel %vm1045_vm5, %v1044_v35, %v2248_v30  ;;  %v1279_v24 = vld [vmem:[%s2444_s12] sm:$0x1] }
  0xe0   : > { %v1048_v38 = vpack.c.bf16 %v1047_v37, %v1046_v36  ;;  %v1492_v32 = vld [vmem:[%s976_s26] sm:$0x1]  ;;  %s2714_s26 = sld [smem:[#allocation10_spill]] }
  0xe1   : > { %v1493_v33 = vpack.c.bf16 %v1492_v32, %v1492_v32  ;;  %v2261_v34 = vld [vmem:[%s2706_s22] sm:$0xff]   ;;  %s2713_s22 = sld [smem:[#allocation9_spill]] }
  0xe2   : > { %2083 = vmatmul.mubr.msk.bf16.vlgmr.msra.gmra.mrb[0].mxu0 %vm1071_vm6, %v1048_v38  ;;  %v1338_v35 = vld [vmem:[%s2707_s23] sm:$0x1]  ;;  %s1462_s23 = sld [smem:[#allocation2 + %s2527_s10]] }
  0xe3   : > { %2098 = vmatprep.mubr.msk.bf16.mxu0 %vm2360_vm1, %v2359_v1  ;;  %2095 = vmatpush3.bf16.msra.mxu0 %v2253_v51 }
  0xe4   : > { %2096 = vmatprep.subr.bf16.mxu0 %v2359_v1 }
  0xe7   : > { %2097 = vmatpush3.bf16.msra.mxu0 %v2254_v52 }
  0xe8   : > { %2110 = vmatprep.subr.bf16.mxu0 %v2359_v1 }
 0x1b5   : > { %v1113_v42 = vpop.f32.mrb[0].mxu0 }
 0x1b6   : > { %v1114_v43 = vadd.f32 %v2011_v41, %v1113_v42  ;;  %v2084_v44 = vpop.f32.mrb[1].mxu0  ;;  %v2260_v42 = vld [vmem:[%s2708_s1] sm:$0xff]   ;;  %s2715_s1 = sld [smem:[#allocation11_spill]] }
 0x1b7   : > { %v1116_v45 = vpop.f32.mrb[2].mxu0  ;;  %v1496_v44 = vld [vmem:[%s2709_s2] sm:$0x1]  ;;  %s2657_s2 = sshll.u32 %s2567_s28, 3 }
 0x1b8   : > { %v1117_v46 = vadd.f32 %v2011_v41, %v1116_v45  ;;  %v2085_v47 = vpop.f32.mrb[3].mxu0  ;;  %v1120_v48 = vmax.f32 %v1114_v43, 0.0  ;;  %s980_s10 = scalar_lea.vmem %s2713_s22, %s2657_s2 }
 0x1ba   : > { %v1121_v49 = vmax.f32 %v1117_v46, 0.0 }
 0x1bc   : > { %v1122_v50 = vpack.c.bf16 %v1121_v49, %v1120_v48  ;;  %s988_s28 = scalar_lea.vmem %s2715_s1, %s2657_s2 }
 0x1be   : > { %2091 = vmatmul.mubr.msk.bf16.vlgmr.msra.gmra.mrb[0].mxu1 %vm1146_vm7, %v1122_v50 }
 0x1bf   : > { %2106 = vmatprep.mubr.msk.bf16.mxu1 %vm2360_vm1, %v2359_v1  ;;  %2103 = vmatpush3.bf16.msra.mxu1 %v2255_v63 }
 0x1c0   : > { %2104 = vmatprep.subr.bf16.mxu1 %v2359_v1 }
 0x1c3   : > { %2105 = vmatpush3.bf16.msra.mxu1 %v2256_v0 }
 0x1c4   : > { %2116 = vmatprep.subr.bf16.mxu1 %v2359_v1 }
 0x291   : > { %v1184_v54 = vpop.f32.mrb[0].mxu1 }
 0x292   : > { %v1185_v55 = vadd.f32 %v2015_v53, %v1184_v54  ;;  %v2092_v56 = vpop.f32.mrb[1].mxu1 }
 0x293   : > { %v1187_v57 = vpop.f32.mrb[2].mxu1 }
 0x294   : > { %v1188_v58 = vadd.f32 %v2015_v53, %v1187_v57  ;;  %v2093_v59 = vpop.f32.mrb[3].mxu1  ;;  %v1191_v60 = vmax.f32 %v1185_v55, 0.0  ;;  %v1393_v57 = vld [vmem:[%s2710_s0] sm:$0x1]  ;;  %s984_s0 = scalar_lea.vmem %s2714_s26, %s2657_s2 }
 0x296   : > { %v1192_v61 = vmax.f32 %v1188_v58, 0.0 }
 0x298   : > { %v1193_v62 = vpack.c.bf16 %v1192_v61, %v1191_v60 }
 0x29a   : > { %2099 = vmatmul.mubr.msk.bf16.vlgmr.msra.gmra.mrb[4].mxu0 %vm1146_vm7, %v1193_v62 }
 0x29b   : > { %2112 = vmatprep.mubr.msk.bf16.mxu0 %vm2360_vm1, %v2359_v1  ;;  %2111 = vmatpush3.bf16.msra.mxu0 %v2257_v2 }
 0x29c   : > { %2122 = vmatprep.subr.bf16.mxu0 %v2359_v1 }
 0x36d   : > { %v1254_v4 = vpop.f32.mrb[4].mxu0 }
 0x36e   : > { %v1255_v5 = vadd.f32 %v2019_v3, %v1254_v4  ;;  %v2100_v6 = vpop.f32.mrb[5].mxu0 }
 0x36f   : > { %v1257_v7 = vpop.f32.mrb[6].mxu0 }
 0x370   : > { %v1261_v8 = vmax.f32 %v1255_v5, 0.0  ;;  %v1258_v9 = vadd.f32 %v2019_v3, %v1257_v7  ;;  %v2101_v10 = vpop.f32.mrb[7].mxu0 }
 0x372   : > { %v1262_v11 = vmax.f32 %v1258_v9, 0.0  ;;  %v1263_v12 = vsel %vm1146_vm7, %v1261_v8, 0.0 }
 0x374   : > { %v1265_v13 = vsel %vm1264_vm8, %v1262_v11, 0.0 }
 0x375   : > { %v1266_v14 = vadd.f32 %v1265_v13, %v1263_v12 }
 0x377   : > { %v1267_v15 = vrot.slane %v1266_v14, 4 }
 0x379   : > { %v1268_v16 = vadd.f32 %v1267_v15, %v1266_v14  ;;  %v1656_v14 = vld [vmem:[%s2711_s11] sm:$0x3]  ;;  %s2716_s11 = sld [smem:[#allocation18_spill]] }
 0x37a   : > { %v1667_v15 = vsel %vm1665_vm10, %v1656_v14, 0 }
 0x37b   : > { %v1269_v17 = vrot.slane %v1268_v16, 2 }
 0x37d   : > { %v1270_v18 = vadd.f32 %v1269_v17, %v1268_v16  ;;  %v2262_v16 = vld [vmem:[%s2712_s15] sm:$0xff]  }
 0x37f   : > { %v1271_v19 = vrot.slane %v1270_v18, 1 }
 0x381   : > { %v1272_v20 = vadd.f32 %v1271_v19, %v1270_v18 }
 0x383   : > { %v1273_v21 = vmul.f32 0.083333336, %v1272_v20 }
 0x385   : > { %v1274_v22 = vpack.c.bf16 %v1273_v21, %v1273_v21 }
 0x387   : > { %2107 = vmatmul.mubr.msk.bf16.vlgmr.msra.gmra.mrb[4].mxu1 %vm1146_vm7, %v1274_v22  ;;  %v1455_v22 = vstv %s1454_s18  ;;  %s992_s18 = scalar_lea.vmem %s2519_s27, %s2657_s2 }
 0x388   : > { %2118 = vmatprep.mubr.msk.bf16.mxu1 %vm2360_vm1, %v2359_v1  ;;  %2117 = vmatpush3.bf16.msra.mxu1 %v2259_v23 }
 0x389   : > { %2128 = vmatprep.subr.bf16.mxu1 %v2359_v1 }
 0x45a   : > { %v1329_v25 = vpop.f32.mrb[4].mxu1 }
 0x45b   : > { %v1330_v26 = vadd.f32 %v1329_v25, %v1279_v24  ;;  %v2108_v27 = vpop.f32.mrb[5].mxu1  ;;  %v1463_v25 = vstv %s1462_s23 }
 0x45c   : > { %v1332_v28 = vpop.f32.mrb[6].mxu1  ;;  %vm1466_vm12 = vcmp.eq.f32.partialorder %v1463_v25, inf  ;;  %v1469_v32 = vand.u32 2147483648, %v1463_v25  ;;  %vm1468_vm14 = vcmp.eq.f32.partialorder %v1463_v25, 0.0 }
 0x45d   : > { %v1335_v30 = vpack.c.bf16 %v1330_v26, %v1330_v26  ;;  %v2109_v31 = vpop.f32.mrb[7].mxu1  ;;  %v1471_v26 = vsub.f32 1.0, %v1463_v25 }
 0x45f   : > { %2113 = vmatmul.mubr.msk.bf16.vlgmr.msra.gmra.mrb[8].mxu0 %vm1345_vm9, %v1335_v30  ;;  %v1472_v27 = vmax.f32 %v1471_v26, 0.0 }
 0x460   : > { %2123 = vmatpush3.bf16.msra.mxu0 %v2258_v29  ;;  %2124 = vmatprep.mubr.msk.bf16.mxu0 %vm2360_vm1, %v2359_v1 }
 0x461   : > { %2134 = vmatprep.subr.bf16.mxu0 %v2359_v1  ;;  %vm1475_vm13 = vcmp.eq.f32.partialorder %v1472_v27, inf  ;;  %vm1477_vm15 = vcmp.eq.f32.partialorder %v1472_v27, 0.0 }
 0x467   : > { %2125 = vmatmul.mubr.msk.bf16.vlgmr.msra.gmra.mrb[12].mxu0 %vm1345_vm9, %v1493_v33  ;;  %v1478_v33 = vand.u32 2147483648, %v1472_v27 }
 0x468   : > { %2136 = vmatprep.mubr.msk.bf16.mxu0 %vm2360_vm1, %v2359_v1  ;;  %2135 = vmatpush3.bf16.msra.mxu0 %v2261_v34 }
 0x469   : > { %2146 = vmatprep.subr.bf16.mxu0 %v2359_v1 }
 0x532   : > { %v1383_v36 = vpop.f32.mrb[8].mxu0 }
 0x533   : > { %v1384_v37 = vadd.f32 %v1383_v36, %v1338_v35  ;;  %v2114_v38 = vpop.f32.mrb[9].mxu0 }
 0x534   : > { %v1386_v39 = vpop.f32.mrb[10].mxu0  ;;  %v1480_v38 = vld [vmem:[%s980_s10] sm:$0xff] }
 0x535   : > { %v1389_v40 = vmax.f32 %v1384_v37, 0.0  ;;  %v2115_v41 = vpop.f32.mrb[11].mxu0  ;;  %v1482_v39 = vld [vmem:[%s984_s0] sm:$0xff] }
 0x537   : > { %v1390_v43 = vpack.c.bf16 %v1389_v40, %v1389_v40 }
 0x539   : > { %2119 = vmatmul.mubr.msk.bf16.vlgmr.msra.gmra.mrb[8].mxu1 %vm1345_vm9, %v1390_v43 }
 0x53a   : > { %v1540_v45 = vpop.f32.mrb[12].mxu0  ;;  %2129 = vmatpush3.bf16.msra.mxu1 %v2260_v42  ;;  %2130 = vmatprep.mubr.msk.bf16.mxu1 %vm2360_vm1, %v2359_v1  ;;  %v1485_v42 = vld [vmem:[%s988_s28] sm:$0xff] }
 0x53b   : > { %v1541_v46 = vadd.f32 %v1540_v45, %v1496_v44  ;;  %v2126_v47 = vpop.f32.mrb[13].mxu0  ;;  %2140 = vmatprep.subr.bf16.mxu1 %v2359_v1 }
 0x53c   : > { %v1543_v48 = vpop.f32.mrb[14].mxu0 }
 0x53d   : > { %v1546_v49 = vsub.f32 0.0, %v1541_v46  ;;  %v2127_v50 = vpop.f32.mrb[15].mxu0  ;;  %v2263_v48 = vld [vmem:[%s2712_s15 + $0x8] sm:$0xff]  }
 0x53e   : > { %v1657_v50 = vlaneseq }
 0x53f   : > { %v1547_v51 = vmul.f32 1.442695, %v1546_v49  ;;  %v2264_v49 = vld [vmem:[%s2509_s17] sm:$0xff]  }
 0x541   : > { %2266 = vpow2.f32 %v1547_v51  ;;  %2131 = vmatmul.mubr.msk.bf16.vlgmr.msra.gmra.mrb[12].mxu1 %vm1345_vm9, %v1335_v30  ;;  %v1658_v51 = vshrl.u32 %v1657_v50, 7 }
 0x542   : > { %2142 = vmatprep.mubr.msk.bf16.mxu1 %vm2360_vm1, %v2359_v1  ;;  %2141 = vmatpush3.bf16.msra.mxu1 %v1667_v15 }
 0x543   : > { %2154 = vmatprep.subr.bf16.mxu1 %v2359_v1 }
 0x54b   : > { %v2267_v52 = vpop.eup %2266 }
 0x54c   : > { %v1549_v53 = vadd.f32 1.0, %v2267_v52  ;;  %v1653_v52 = vld [vmem:[%s2716_s11] sm:$0x1] }
 0x54e   : > { %2268 = vrcp.f32 %v1549_v53 }
 0x558   : > { %v2269_v54 = vpop.eup %2268 }
 0x559   : > { %v1552_v55 = vmul.f32 %v2269_v54, %v1541_v46  ;;  %v1659_v54 = vsub.s32 0, %v1658_v51 }
 0x55b   : > { %v1553_v56 = vpack.c.bf16 %v1552_v55, %v1552_v55 }
 0x55d   : > { %2137 = vmatmul.mubr.msk.bf16.vlgmr.msra.gmra.mrb[16].mxu0 %vm1345_vm9, %v1553_v56 }
 0x55e   : > { %2150 = vmatprep.mubr.msk.bf16.mxu0 %vm2360_vm1, %v2359_v1  ;;  %2147 = vmatpush3.bf16.msra.mxu0 %v2262_v16 }
 0x55f   : > { %2148 = vmatprep.subr.bf16.mxu0 %v2359_v1 }
 0x562   : > { %2149 = vmatpush3.bf16.msra.mxu0 %v2263_v48 }
 0x60c   : > { %v1437_v58 = vpop.f32.mrb[8].mxu1 }
 0x60d   : > { %v1438_v59 = vadd.f32 %v1437_v58, %v1393_v57  ;;  %v2120_v60 = vpop.f32.mrb[9].mxu1 }
 0x60e   : > { %v1440_v61 = vpop.f32.mrb[10].mxu1 }
 0x60f   : > { %v1449_v62 = vmul.f32 1.442695, %v1438_v59  ;;  %v2121_v63 = vpop.f32.mrb[11].mxu1  ;;  %v1443_v17 = vsub.f32 0.0, %v1438_v59 }
 0x610   : > { %v2037_v63 = vld [vmem:[%s2504_s29] ss:$0 sm:$0xff] }
 0x611   : > { %2270 = vpow2.f32 %v1449_v62  ;;  %v1444_v18 = vmul.f32 1.442695, %v1443_v17 }
 0x614   : > { %v1598_v0 = vpop.f32.mrb[12].mxu1 }
 0x615   : > { %v2132_v2 = vpop.f32.mrb[13].mxu1 }
 0x616   : > { %v1601_v3 = vpop.f32.mrb[14].mxu1 }
 0x617   : > { %v2133_v4 = vpop.f32.mrb[15].mxu1 }
 0x61b   : > { %v2271_v5 = vpop.eup %2270 }
 0x61c   : > { %v1451_v6 = vadd.f32 1.0, %v2271_v5 }
 0x61e   : > { %2272 = vlog2.f32 %v1451_v6 }
 0x61f   : > { %2274 = vpow2.f32 %v1444_v18 }
 0x628   : > { %v2273_v7 = vpop.eup %2272 }
 0x629   : > { %v1453_v8 = vmul.f32 0.6931472, %v2273_v7  ;;  %v2275_v19 = vpop.eup %2274 }
 0x62a   : > { %v1446_v20 = vadd.f32 1.0, %v2275_v19 }
 0x62b   : > { %1458 = vrot.lane.b32.xlu0 %v1453_v8, %s2365_s16  ;;  %v2041_v8 = vld [vmem:[%s2514_s21] ss:$0 sm:$0xff] }
 0x62c   : > { %2276 = vrcp.f32 %v1446_v20 }
 0x62d   : > { %2278 = vrsqrt.f32 %v1463_v25 }
 0x62e   : > { %2280 = vrsqrt.f32 %v1472_v27 }
 0x630   : > { %v1647_v9 = vpop.f32.mrb[16].mxu0 }
 0x631   : > { %v2648_v10 = vadd.f32 %v1647_v9, %v1598_v0  ;;  %v2138_v11 = vpop.f32.mrb[17].mxu0 }
 0x632   : > { %v1650_v12 = vpop.f32.mrb[18].mxu0 }
 0x633   : > { %v2139_v13 = vpop.f32.mrb[19].mxu0  ;;  %v1654_v53 = vadd.f32 %v1653_v52, %v2648_v10 }
 0x635   : > { %v1660_v55 = vrot.slane %v1654_v53, %v1659_v54 }
 0x636   : > { %v2277_v21 = vpop.eup %2276 }
 0x637   : > { %vm1456_vm11 = vcmp.lt.f32.partialorder %v1455_v22, %v2277_v21  ;;  %v2279_v28 = vpop.eup %2278 }
 0x638   : > { %v2281_v29 = vpop.eup %2280  ;;  %v1465_v30 = vmul.f32 %v2279_v28, %v1463_v25 }
 0x639   : > { %v1474_v31 = vmul.f32 %v2281_v29, %v1472_v27 }
 0x63a   : > { %v1467_v34 = vsel %vm1466_vm12, %v1463_v25, %v1465_v30 }
 0x63b   : > { %v1476_v35 = vsel %vm1475_vm13, %v1472_v27, %v1474_v31  ;;  %v1470_v36 = vsel %vm1468_vm14, %v1469_v32, %v1467_v34 }
 0x63c   : > { %v1479_v37 = vsel %vm1477_vm15, %v1478_v33, %v1476_v35  ;;  %v1481_v40 = vmul.f32 %v1480_v38, %v1470_v36 }
 0x63d   : > { %v1483_v41 = vmul.f32 %v1482_v39, %v1479_v37 }
 0x63f   : > { %v1484_v43 = vadd.f32 %v1483_v41, %v1481_v40 }
 0x69d   : > { %v1459_v23 = vpop.permute.xlu0 %1458 }
 0x69e   : > { %v1461_v24 = vsel %vm1456_vm11, %v1459_v23, 0.0 }
 0x69f   : > { %2162 = vpush %v1461_v24 }
 0x6d0   : > { %s2163_s16 = spop %2162 }
 0x6d1   : > { %v1488_v44 = vstv %s2163_s16 }
 0x6d2   : > { %v1490_v45 = vmul.f32 %v1488_v44, %v1485_v42 }
 0x6d4   : > { %v1491_v46 = vadd.f32 %v1490_v45, %v1484_v43 }
 0x6d6   : > { %v1655_v47 = vpack.c.bf16 %v1491_v46, %v1491_v46 }
 0x6d8   : > { %2143 = vmatmul.mubr.msk.bf16.vlgmr.msra.gmra.mrb[16].mxu1 %vm1661_vm0, %v1655_v47 }
 0x6d9   : > { %2158 = vmatprep.mubr.msk.bf16.mxu1 %vm2360_vm1, %v2359_v1  ;;  %2155 = vmatpush3.bf16.msra.mxu1 %v2264_v49  ;;  %vm1845_vm1 = vcmask 64512  }
 0x6da   : > { %2156 = vmatprep.subr.bf16.mxu1 %v2359_v1  ;;  %v2265_v1 = vld [vmem:[%s2509_s17 + $0x8] sm:$0xff]  }
 0x6dd   : > { %2157 = vmatpush3.bf16.msra.mxu1 %v2265_v1 }
 0x7ab   : > { %v1703_v56 = vpop.f32.mrb[16].mxu1 }
 0x7ac   : > { %v1704_v57 = vadd.f32 %v1703_v56, %v1660_v55  ;;  %v2144_v58 = vpop.f32.mrb[17].mxu1 }
 0x7ad   : > { %v1706_v59 = vpop.f32.mrb[18].mxu1 }
 0x7ae   : > { %v1709_v60 = vmax.f32 %v1704_v57, 0.0  ;;  %v2145_v61 = vpop.f32.mrb[19].mxu1 }
 0x7b0   : > { %v1710_v62 = vpack.c.bf16 %v1709_v60, %v1709_v60 }
 0x7b2   : > { %2151 = vmatmul.mubr.msk.bf16.vlgmr.msra.gmra.mrb[20].mxu0 %vm1146_vm7, %v1710_v62 }
 0x885   : > { %v1771_v0 = vpop.f32.mrb[20].mxu0 }
 0x886   : > { %v1772_v2 = vadd.f32 %v2037_v63, %v1771_v0  ;;  %v2152_v3 = vpop.f32.mrb[21].mxu0 }
 0x887   : > { %v1774_v4 = vpop.f32.mrb[22].mxu0 }
 0x888   : > { %v1777_v5 = vmax.f32 %v1772_v2, 0.0  ;;  %v2153_v6 = vpop.f32.mrb[23].mxu0 }
 0x88a   : > { %v1778_v7 = vpack.c.bf16 %v1777_v5, %v1777_v5 }
 0x88c   : > { %2159 = vmatmul.mubr.msk.bf16.vlgmr.msra.gmra.mrb[20].mxu1 %vm1146_vm7, %v1778_v7 }
 0x95f   : > { %v1839_v9 = vpop.f32.mrb[20].mxu1 }
 0x960   : > { %v1840_v10 = vadd.f32 %v2041_v8, %v1839_v9  ;;  %v2160_v11 = vpop.f32.mrb[21].mxu1 }
 0x961   : > { %v1842_v12 = vpop.f32.mrb[22].mxu1 }
 0x962   : > { %1846 = vst.msk [vmem:[%s992_s18] sm:$0xff] %vm1845_vm1, %v1840_v10  ;;  %v2161_v13 = vpop.f32.mrb[23].mxu1 }
 0x963 PF: > { %s71_s7 = sadd.s32 1, %s2326_s7  }
 0x964   : > { %p68_p5 = scmp.ge.s32.totalorder %s71_s7, 4  }
 0x966   :  { %70 = sbr.rel (!%p68_p5) target bundleno = 45 (0x2d), region = 216 }
 0x96d   :  { %1866 = vsyncpa [#allocation3], 1 }
 0x96e   :  { %1868 = vsyncpa [#allocation3 + $0x1], 1 }
 0x96f   :  { %1869 = vsyncpa [#allocation5], 1 }

</bundles_post_ra>
